<compile_context>
chip_gen: v5e
topology: v5e:2x2
jax: 0.10.0
libtpu: 0.0.40
codegen_flags: <defaults>
</compile_context>

<pallas_src>
import functools

import jax
import jax.numpy as jnp
from jax.experimental import pallas as pl
from jax.experimental.pallas import tpu as pltpu

# Module hyper-parameters (globals in the original PyTorch file).
LATENT_SIZE = 6
HIDDEN_DIM = 32
_Y = HIDDEN_DIM - LATENT_SIZE - 2          # 24 = width of block1's output
_WCOLS = 128                               # lane-padded width of weight slab


def decoder_kernel(in_ref, w_ref, out_ref):
    # Input slab (8, tb): rows = [xr0, xr1, latent(6)]  (rotation already applied)
    xin = in_ref[...]

    # Packed weight slab (32, 128): static slices are free views.
    w1T = w_ref[:, 0:8]          # (32, 8)   = w1.T
    w2Tp = w_ref[:, 8:40]        # (32, 32)  = w2.T zero-padded (rows >= 24 zero)
    w3yTp = w_ref[:, 40:72]      # (32, 32)  = w3.T[:, :24]  (cols >= 24 zero)
    w3inT = w_ref[:, 72:80]      # (32, 8)   = w3.T[:, 24:32]
    b1 = w_ref[:, 80:81]         # (32, 1)
    b2 = w_ref[:, 81:82]         # (32, 1)   (rows >= 24 zero)
    b3 = w_ref[:, 82:83]         # (32, 1)
    b4 = w_ref[0:1, 83:84]       # (1, 1)
    w4r = w_ref[0:8, 84:116]     # (8, 32)   row 0 = w4, rows 1..7 zero

    # block1: Linear -> ReLU -> Linear -> ReLU (batch on lanes, MXU matmuls).
    h1 = jnp.maximum(
        jnp.dot(w1T, xin, preferred_element_type=jnp.float32) + b1, 0.0)
    # yp rows 0:23 = y, rows 24:31 = 0 (killed by the zero columns of w3yTp).
    yp = jnp.maximum(
        jnp.dot(w2Tp, h1, preferred_element_type=jnp.float32) + b2, 0.0)

    # block2: Linear -> ReLU.  ycat = [y, inputs] folded into two matmuls.
    h3 = jnp.maximum(
        jnp.dot(w3yTp, yp, preferred_element_type=jnp.float32)
        + jnp.dot(w3inT, xin, preferred_element_type=jnp.float32)
        + b3, 0.0)

    # Final Linear(32 -> 1) on the MXU (was a VPU/XLU sublane reduce).
    o = jnp.dot(w4r, h3, preferred_element_type=jnp.float32)   # (8, tb)
    out_ref[...] = o[0:1, :] + b4                               # lane-dense (1, tb)


def _pack_weights(params):
    """Pack all weights/biases into a single (32, 128) f32 slab."""
    H, Y = HIDDEN_DIM, _Y
    f32 = jnp.float32
    w1T = params["w1"].T.astype(f32)                                    # (32, 8)
    w2Tp = jnp.zeros((H, H), f32).at[:Y, :].set(params["w2"].T.astype(f32))
    w3T = params["w3"].T.astype(f32)                                    # (32, 32)
    w3yTp = jnp.zeros((H, H), f32).at[:, :Y].set(w3T[:, :Y])            # (32, 32)
    w3inT = w3T[:, Y:]                                                  # (32, 8)
    b1 = params["b1"].reshape(H, 1).astype(f32)
    b2 = jnp.zeros((H, 1), f32).at[:Y, 0].set(params["b2"].reshape(Y).astype(f32))
    b3 = params["b3"].reshape(H, 1).astype(f32)
    b4c = jnp.broadcast_to(params["b4"].reshape(1, 1).astype(f32), (H, 1))
    w4blk = jnp.zeros((H, H), f32).at[0, :].set(params["w4"].reshape(H).astype(f32))
    slab = jnp.concatenate(
        [w1T, w2Tp, w3yTp, w3inT, b1, b2, b3, b4c, w4blk], axis=1)      # (32, 116)
    return jnp.pad(slab, ((0, 0), (0, _WCOLS - slab.shape[1])))         # (32, 128)


def _pick_tile(B, tb_req):
    """Batch tile: multiple of 128, capped by padded batch; keep grid >= 2
    when the batch allows (v7x: 2 TensorCores share the 'parallel' axis)."""
    tb = max(128, (int(tb_req) // 128) * 128)
    lanes = 128 * pl.cdiv(B, 128)
    if lanes >= 256:
        tb = min(tb, 128 * pl.cdiv(lanes // 2, 128))
    return min(tb, lanes)


@functools.partial(jax.jit, static_argnames=("tb",))
def decoder_forward(g, x, latent, params, tb=8192):
    """g: (B,), x: (B, 2), latent: (B, L). Returns (B, 1)."""
    B = g.shape[0]
    tb = _pick_tile(B, tb)
    Bp = tb * pl.cdiv(B, tb)                       # padded batch (ragged-safe)

    # Rotation folded into the (already required) layout pass: one fused XLA
    # elementwise + concat + transpose + pad producing the (8, Bp) slab.
    gf = g.reshape(B).astype(jnp.float32)
    s, c = jnp.sin(gf), jnp.cos(gf)
    x32 = x.astype(jnp.float32)
    xr0 = c * x32[:, 0] - s * x32[:, 1]
    xr1 = s * x32[:, 0] + c * x32[:, 1]
    inpT = jnp.concatenate(
        [xr0[None, :], xr1[None, :], latent.astype(jnp.float32).T], axis=0)  # (8, B)
    inpT = jnp.pad(inpT, ((0, 0), (0, Bp - B)))                              # (8, Bp)

    wslab = _pack_weights(params)                                            # (32, 128)

    # Scoped-VMEM budget scales with the tile; stays within every chip's
    # physical VMEM (cap = 64 MiB, the v7x per-core ceiling).
    vmem_limit = int(min(64 * 1024 * 1024,
                         max(32 * 1024 * 1024, 1536 * tb + (2 << 20))))

    out_t = pl.pallas_call(
        decoder_kernel,
        out_shape=jax.ShapeDtypeStruct((1, Bp), jnp.float32),
        grid_spec=pltpu.PrefetchScalarGridSpec(
            num_scalar_prefetch=0,
            grid=(Bp // tb,),
            in_specs=[
                pl.BlockSpec((8, tb), lambda i: (0, i)),                # inputs
                pl.BlockSpec((HIDDEN_DIM, _WCOLS), lambda i: (0, 0)),   # weights (fetched once)
            ],
            out_specs=pl.BlockSpec((1, tb), lambda i: (0, i)),          # lane-dense
        ),
        compiler_params=pltpu.CompilerParams(
            dimension_semantics=("parallel",),
            vmem_limit_bytes=vmem_limit),
    )(inpT, wslab)

    return out_t[:, :B].T                                               # (B, 1)


def decoder_reference(g, x, latent, params):
    """Pure-JAX reference, mirroring the PyTorch forward exactly."""
    s, c = jnp.sin(g), jnp.cos(g)
    rot = jnp.stack([jnp.stack([c, s], axis=1),
                     jnp.stack([-s, c], axis=1)], axis=2)        # (B, 2, 2)
    xr = jnp.einsum("bij,bj->bi", rot, x)
    inputs = jnp.concatenate([xr, latent], axis=1)
    h1 = jax.nn.relu(inputs @ params["w1"] + params["b1"])
    y = jax.nn.relu(h1 @ params["w2"] + params["b2"])
    ycat = jnp.concatenate([y, inputs], axis=1)
    h3 = jax.nn.relu(ycat @ params["w3"] + params["b3"])
    return h3 @ params["w4"] + params["b4"]


def init_params(key, latent_size=LATENT_SIZE, hidden_dim=HIDDEN_DIM):
    L, H = latent_size, hidden_dim
    ks = jax.random.split(key, 8)
    mk = lambda k, shp: (0.1 * jax.random.normal(k, shp)).astype(jnp.float32)
    return {
        "w1": mk(ks[0], (L + 2, H)),        "b1": mk(ks[1], (1, H)),
        "w2": mk(ks[2], (H, H - L - 2)),    "b2": mk(ks[3], (1, H - L - 2)),
        "w3": mk(ks[4], (H, H)),            "b3": mk(ks[5], (1, H)),
        "w4": mk(ks[6], (H, 1)),            "b4": mk(ks[7], (1, 1)),
    }


if __name__ == "__main__":
    key = jax.random.PRNGKey(0)
    params = init_params(jax.random.fold_in(key, 0))

    # Small canonical test (B=16), a ragged 2-step-grid test (B=300, default
    # tile keeps grid >= 2), and a longer-grid test (B=1000, tb=256).
    for B, tb in ((16, 8192), (300, 8192), (1000, 256)):
        kb = jax.random.fold_in(key, B)
        kg, kx, kl = jax.random.split(kb, 3)
        g = jax.random.uniform(kg, (B,), jnp.float32, minval=-3.0, maxval=3.0)
        x = jax.random.normal(kx, (B, 2), jnp.float32)
        latent = jax.random.normal(kl, (B, LATENT_SIZE), jnp.float32)

        out = jax.block_until_ready(decoder_forward(g, x, latent, params, tb=tb))
        ref = decoder_reference(g, x, latent, params)
        assert out.shape == (B, 1), out.shape
        assert jnp.allclose(out, ref, atol=1e-4, rtol=1e-4), (
            jnp.max(jnp.abs(out - ref)))

    print("KERNEL_OK")
</pallas_src>

<mosaic_0001>
module attributes {stable_mosaic.version = 11 : i64} {
  func.func @decoder_kernel(%arg0: i32, %arg1: memref<8x128xf32, #tpu.memory_space<vmem>>, %arg2: memref<32x128xf32, #tpu.memory_space<vmem>>, %arg3: memref<1x128xf32, #tpu.memory_space<vmem>>) attributes {dimension_semantics = [#tpu.dimension_semantics<parallel>], iteration_bounds = array<i64: 1>, scalar_prefetch = 0 : i64, scratch_operands = 0 : i64, tpu.core_type = #tpu.core_type<tc>, window_params = [{transform_indices = @transform_0, window_bounds = array<i64: 8, 128>}, {pipeline_mode = #tpu.pipeline_mode<synchronous>, transform_indices = @transform_1, window_bounds = array<i64: 32, 128>}, {transform_indices = @transform_2, window_bounds = array<i64: 1, 128>}]} {
    %c0 = arith.constant 0 : index
    %c0_0 = arith.constant 0 : index
    %0 = vector.load %arg1[%c0, %c0_0] : memref<8x128xf32, #tpu.memory_space<vmem>>, vector<8x128xf32>
    %c0_1 = arith.constant 0 : index
    %c0_2 = arith.constant 0 : index
    %1 = vector.load %arg2[%c0_1, %c0_2] : memref<32x128xf32, #tpu.memory_space<vmem>>, vector<32x8xf32>
    %c0_3 = arith.constant 0 : index
    %c8 = arith.constant 8 : index
    %2 = vector.load %arg2[%c0_3, %c8] : memref<32x128xf32, #tpu.memory_space<vmem>>, vector<32x32xf32>
    %c0_4 = arith.constant 0 : index
    %c40 = arith.constant 40 : index
    %3 = vector.load %arg2[%c0_4, %c40] : memref<32x128xf32, #tpu.memory_space<vmem>>, vector<32x32xf32>
    %c0_5 = arith.constant 0 : index
    %c72 = arith.constant 72 : index
    %4 = vector.load %arg2[%c0_5, %c72] : memref<32x128xf32, #tpu.memory_space<vmem>>, vector<32x8xf32>
    %c0_6 = arith.constant 0 : index
    %c80 = arith.constant 80 : index
    %5 = vector.load %arg2[%c0_6, %c80] : memref<32x128xf32, #tpu.memory_space<vmem>>, vector<32x1xf32>
    %c0_7 = arith.constant 0 : index
    %c81 = arith.constant 81 : index
    %6 = vector.load %arg2[%c0_7, %c81] : memref<32x128xf32, #tpu.memory_space<vmem>>, vector<32x1xf32>
    %c0_8 = arith.constant 0 : index
    %c82 = arith.constant 82 : index
    %7 = vector.load %arg2[%c0_8, %c82] : memref<32x128xf32, #tpu.memory_space<vmem>>, vector<32x1xf32>
    %c0_9 = arith.constant 0 : index
    %c83 = arith.constant 83 : index
    %8 = vector.load %arg2[%c0_9, %c83] : memref<32x128xf32, #tpu.memory_space<vmem>>, vector<1x1xf32>
    %c0_10 = arith.constant 0 : index
    %c84 = arith.constant 84 : index
    %9 = vector.load %arg2[%c0_10, %c84] : memref<32x128xf32, #tpu.memory_space<vmem>>, vector<8x32xf32>
    %cst = arith.constant dense<0.000000e+00> : vector<32x128xf32>
    %10 = tpu.matmul %1, %0, %cst {dimension_numbers = #tpu.dot_dimension_numbers<[1], [0], [0], [1], [0, 0, 1, 1], [], []>} : vector<32x8xf32>, vector<8x128xf32>, vector<32x128xf32> -> vector<32x128xf32>
    %11 = vector.broadcast %5 : vector<32x1xf32> to vector<32x128xf32>
    %12 = arith.addf %10, %11 : vector<32x128xf32>
    %cst_11 = arith.constant 0.000000e+00 : f32
    %13 = vector.broadcast %cst_11 : f32 to vector<32x128xf32>
    %14 = arith.maximumf %12, %13 : vector<32x128xf32>
    %cst_12 = arith.constant dense<0.000000e+00> : vector<32x128xf32>
    %15 = tpu.matmul %2, %14, %cst_12 {dimension_numbers = #tpu.dot_dimension_numbers<[1], [0], [0], [1], [0, 0, 1, 1], [], []>} : vector<32x32xf32>, vector<32x128xf32>, vector<32x128xf32> -> vector<32x128xf32>
    %16 = vector.broadcast %6 : vector<32x1xf32> to vector<32x128xf32>
    %17 = arith.addf %15, %16 : vector<32x128xf32>
    %cst_13 = arith.constant 0.000000e+00 : f32
    %18 = vector.broadcast %cst_13 : f32 to vector<32x128xf32>
    %19 = arith.maximumf %17, %18 : vector<32x128xf32>
    %cst_14 = arith.constant dense<0.000000e+00> : vector<32x128xf32>
    %20 = tpu.matmul %3, %19, %cst_14 {dimension_numbers = #tpu.dot_dimension_numbers<[1], [0], [0], [1], [0, 0, 1, 1], [], []>} : vector<32x32xf32>, vector<32x128xf32>, vector<32x128xf32> -> vector<32x128xf32>
    %cst_15 = arith.constant dense<0.000000e+00> : vector<32x128xf32>
    %21 = tpu.matmul %4, %0, %cst_15 {dimension_numbers = #tpu.dot_dimension_numbers<[1], [0], [0], [1], [0, 0, 1, 1], [], []>} : vector<32x8xf32>, vector<8x128xf32>, vector<32x128xf32> -> vector<32x128xf32>
    %22 = arith.addf %20, %21 : vector<32x128xf32>
    %23 = vector.broadcast %7 : vector<32x1xf32> to vector<32x128xf32>
    %24 = arith.addf %22, %23 : vector<32x128xf32>
    %cst_16 = arith.constant 0.000000e+00 : f32
    %25 = vector.broadcast %cst_16 : f32 to vector<32x128xf32>
    %26 = arith.maximumf %24, %25 : vector<32x128xf32>
    %cst_17 = arith.constant dense<0.000000e+00> : vector<8x128xf32>
    %27 = tpu.matmul %9, %26, %cst_17 {dimension_numbers = #tpu.dot_dimension_numbers<[1], [0], [0], [1], [0, 0, 1, 1], [], []>} : vector<8x32xf32>, vector<32x128xf32>, vector<8x128xf32> -> vector<8x128xf32>
    %28 = vector.extract_strided_slice %27 {offsets = [0, 0], sizes = [1, 128], strides = [1, 1]} : vector<8x128xf32> to vector<1x128xf32>
    %29 = vector.broadcast %8 : vector<1x1xf32> to vector<1x128xf32>
    %30 = arith.addf %28, %29 : vector<1x128xf32>
    %c0_18 = arith.constant 0 : index
    %c0_19 = arith.constant 0 : index
    %31 = vector.load %arg3[%c0_18, %c0_19] : memref<1x128xf32, #tpu.memory_space<vmem>>, vector<1x128xf32>
    tpu.vector_store %arg3[%c0_18, %c0_19], %30 {strides = array<i32>} : memref<1x128xf32, #tpu.memory_space<vmem>>, vector<1x128xf32>,
    return
  }
  func.func @transform_0(%arg0: i32) -> (i32, i32) {
    %c0_i32 = arith.constant 0 : i32
    %c0_i32_0 = arith.constant 0 : i32
    return %c0_i32, %arg0 : i32, i32
  }
  func.func @transform_1(%arg0: i32) -> (i32, i32) {
    %c0_i32 = arith.constant 0 : i32
    %c0_i32_0 = arith.constant 0 : i32
    %c0_i32_1 = arith.constant 0 : i32
    return %c0_i32, %c0_i32_0 : i32, i32
  }
  func.func @transform_2(%arg0: i32) -> (i32, i32) {
    %c0_i32 = arith.constant 0 : i32
    %c0_i32_0 = arith.constant 0 : i32
    return %c0_i32, %arg0 : i32, i32
  }
}

</mosaic_0001>

<bundles_post_ra>
// kernel: decoder_forward.1
= control target key start
LH: loop header
LB: loop body
LE: loop exit
PB: predicated region body
PF: predicated region fallthrough
CT: control target
= control target key end

     0   :  { %vm38_vm0 = vcmask 64512   ;;  %v330_v2 = vmov 80   ;;  %v332_v11 = vmov 81   ;;  %s333_s19 = smov 56   ;;  %vm104_vm1 = vcmask 261120   ;;  %s334_s20 = smov 88   ;;  %s428_s0 = inlined_call_operand.vmem [shape: f32[8,128], index: 0, kind: input, shape index: {}]   ;;  %s429_s1 = inlined_call_operand.vmem [shape: f32[32,128], index: 1, kind: input, shape index: {}]   ;;  %s430_s2 = inlined_call_operand.vmem [shape: f32[1,128], index: 2, kind: output, shape index: {}]  }
   0x1   :  { %v11_v0 = vld [vmem:[%s428_s0] sm:$0xff]  ;;  %322 = vset.pattern.permute.xlu1 %v330_v2  ;;  %v364_v3 = vld [vmem:[%s429_s1 + $0x8] sm:$0xff]  ;;  %321 = vset.pattern.permute.xlu0 %v330_v2  ;;  %v370_v4 = vld [vmem:[%s429_s1 + $0x18] sm:$0xff]  ;;  %s331_s0 = smov 120   ;;  %v335_v36 = vmov 82   ;;  %s336_s21 = smov 44  }
   0x2   :  { %v359_v1 = vld [vmem:[%s429_s1] sm:$0xff]  ;;  %62 = vmatpush.msra.mxu0 %v11_v0  ;;  %25 = vperm.xlu1 %322, %v364_v3   ;;  %v380_v5 = vld [vmem:[%s429_s1 + $0x10] sm:$0xff]  ;;  %v337_v56 = vmov 83  }
   0x3   :  { %296 = vmatmul.msk.f32.vlgmr.msra.gmra.mxu0 %vm38_vm0, %v359_v1  ;;  %35 = vperm.xlu0 %321, %v370_v4   ;;  %v16_v55 = vld [vmem:[%s429_s1] sm:$0x1] }
   0x4   :  { %96 = vrot.lane.b32.xlu2 %v359_v1, %s331_s0  ;;  %177 = vmatpush.msra.mxu2 %v11_v0 }
   0x5   :  { %323 = vset.pattern.permute.xlu2 %v332_v11 }
   0xa   :  { %20 = vperm.xlu1 %322, %v359_v1  }
   0xb   :  { %297 = vmatmul.msk.f32.gmra.mxu0 %vm38_vm0, %v364_v3  ;;  %30 = vperm.xlu0 %321, %v380_v5  }
   0xc   :  { %98 = vrot.lane.b32.xlu2 %v364_v3, %s331_s0 }
  0x12   :  { %102 = vrot.lane.b32.xlu1 %v370_v4, %s331_s0 }
  0x13   :  { %298 = vmatmul.msk.f32.gmra.mxu0 %vm38_vm0, %v380_v5  ;;  %100 = vrot.lane.b32.xlu0 %v380_v5, %s331_s0 }
  0x14   :  { %325 = vset.pattern.permute.xlu1 %v332_v11  ;;  %324 = vset.pattern.permute.xlu0 %v332_v11 }
  0x15   :  { %93 = vperm.xlu2 %323, %v370_v4  }
  0x1a   :  { %85 = vperm.xlu1 %325, %v364_v3  }
  0x1b   :  { %299 = vmatmul.msk.f32.gmra.mxu0 %vm38_vm0, %v370_v4  ;;  %89 = vperm.xlu0 %324, %v380_v5  }
  0x1d   :  { %81 = vperm.xlu2 %323, %v359_v1  }
  0x22   :  { %146 = vrot.lane.b32.xlu1 %v359_v1, %s333_s19 }
  0x23   :  { %148 = vrot.lane.b32.xlu0 %v364_v3, %s333_s19  ;;  %327 = vset.pattern.permute.xlu1 %v335_v36 }
  0x24   :  { %326 = vset.pattern.permute.xlu0 %v335_v36 }
  0x25   :  { %191 = vrot.lane.b32.xlu2 %v359_v1, %s334_s20 }
  0x26   :  { %328 = vset.pattern.permute.xlu2 %v335_v36 }
  0x2a   :  { %193 = vrot.lane.b32.xlu1 %v364_v3, %s334_s20 }
  0x2b   :  { %195 = vrot.lane.b32.xlu0 %v380_v5, %s334_s20 }
  0x2d   :  { %150 = vrot.lane.b32.xlu2 %v380_v5, %s333_s19 }
  0x32   :  { %152 = vrot.lane.b32.xlu1 %v370_v4, %s333_s19 }
  0x33   :  { %249 = vperm.xlu0 %326, %v370_v4  }
  0x35   :  { %197 = vrot.lane.b32.xlu2 %v370_v4, %s334_s20 }
  0x3a   :  { %245 = vperm.xlu1 %327, %v380_v5  }
  0x3b   :  { %329 = vset.pattern.permute.xlu0 %v337_v56 }
  0x3c   :  { %287 = vperm.xlu0 %329, %v16_v55  }
  0x3d   :  { %241 = vperm.xlu2 %328, %v364_v3  }
  0x42   :  { %237 = vperm.xlu1 %327, %v359_v1  }
  0x45   :  { %261 = vrot.lane.b32.xlu2 %v359_v1, %s336_s21 }
  0x5e   :  { %v97_v22 = vpop.permute.xlu2 %96 }
  0x66   :  { %v99_v24 = vpop.permute.xlu2 %98 }
  0x6f   :  { %v94_v27 = vpop.permute.xlu2 %93 }
  0x74   :  { %v26_v9 = vpop.permute.xlu1 %25 }
  0x75   :  { %v36_v8 = vpop.permute.xlu0 %35 }
  0x77   :  { %v82_v29 = vpop.permute.xlu2 %81 }
  0x7c   :  { %v21_v16 = vpop.permute.xlu1 %20 }
  0x7d   :  { %v31_v12 = vpop.permute.xlu0 %30 }
  0x7f   :  { %v192_v33 = vpop.permute.xlu2 %191 }
  0x80   :  { %v64_v6 = vpop.f32.mrf.mxu0 }
  0x81   :  { %v65_v19 = vadd.f32 %v64_v6, %v21_v16 }
  0x83   :  { %v76_v23 = vmax.f32 %v65_v19, 0.0 }
  0x84   :  { %v103_v26 = vpop.permute.xlu1 %102 }
  0x85   :  { %v101_v25 = vpop.permute.xlu0 %100 }
  0x87   :  { %v151_v38 = vpop.permute.xlu2 %150 }
  0x88   :  { %v67_v7 = vpop.f32.mrf.mxu0 }
  0x89   :  { %v68_v17 = vadd.f32 %v67_v7, %v26_v9 }
  0x8b   :  { %v77_v21 = vmax.f32 %v68_v17, 0.0 }
  0x8c   :  { %v86_v28 = vpop.permute.xlu1 %85 }
  0x8d   :  { %v90_v30 = vpop.permute.xlu0 %89 }
  0x8f   :  { %v198_v51 = vpop.permute.xlu2 %197 }
  0x90   :  { %v70_v10 = vpop.f32.mrf.mxu0 }
  0x91   :  { %v71_v14 = vadd.f32 %v70_v10, %v31_v12 }
  0x93   :  { %v78_v20 = vmax.f32 %v71_v14, 0.0 }
  0x94   :  { %v147_v32 = vpop.permute.xlu1 %146 }
  0x95   :  { %304 = vmatmul.msk.f32.vlgmr.msra.gmra.mxu2 %vm38_vm0, %v147_v32  ;;  %v149_v34 = vpop.permute.xlu0 %148 }
  0x97   :  { %v242_v3 = vpop.permute.xlu2 %241 }
  0x98   :  { %v73_v13 = vpop.f32.mrf.mxu0 }
  0x99   :  { %v74_v15 = vadd.f32 %v73_v13, %v36_v8 }
  0x9b   :  { %v79_v18 = vmax.f32 %v74_v15, 0.0 }
  0x9c   :  { %v194_v37 = vpop.permute.xlu1 %193 }
  0x9d   :  { %125 = vmatpush.msra.mxu1 %v79_v18  ;;  %305 = vmatmul.msk.f32.gmra.mxu2 %vm38_vm0, %v149_v34  ;;  %v196_v50 = vpop.permute.xlu0 %195 }
  0x9f   :  { %126 = vmatpush.msra.mxu1 %v78_v20  ;;  %v262_v14 = vpop.permute.xlu2 %261 }
  0xa1   :  { %127 = vmatpush.msra.mxu1 %v77_v21 }
  0xa3   :  { %128 = vmatpush.msra.mxu1 %v76_v23 }
  0xa4   :  { %300 = vmatmul.msk.f32.vlgmr.msra.gmra.mxu1 %vm104_vm1, %v97_v22  ;;  %v153_v40 = vpop.permute.xlu1 %152 }
  0xa5   :  { %306 = vmatmul.msk.f32.gmra.mxu2 %vm38_vm0, %v151_v38  ;;  %v250_v0 = vpop.permute.xlu0 %249 }
  0xac   :  { %301 = vmatmul.msk.f32.gmra.mxu1 %vm104_vm1, %v99_v24  ;;  %v246_v60 = vpop.permute.xlu1 %245 }
  0xad   :  { %307 = vmatmul.msk.f32.gmra.mxu2 %vm38_vm0, %v153_v40 }
  0xae   :  { %v288_v15 = vpop.permute.xlu0 %287 }
  0xb4   :  { %302 = vmatmul.msk.f32.gmra.mxu1 %vm104_vm1, %v101_v25  ;;  %v238_v7 = vpop.permute.xlu1 %237 }
  0xbc   :  { %303 = vmatmul.msk.f32.gmra.mxu1 %vm104_vm1, %v103_v26 }
 0x118   :  { %v179_v52 = vpop.f32.mrf.mxu2 }
 0x120   :  { %v182_v54 = vpop.f32.mrf.mxu2 }
 0x121   :  { %v130_v31 = vpop.f32.mrf.mxu1 }
 0x122   :  { %v131_v46 = vadd.f32 %v130_v31, %v82_v29 }
 0x124   :  { %v142_v49 = vmax.f32 %v131_v46, 0.0 }
 0x128   :  { %v185_v58 = vpop.f32.mrf.mxu2 }
 0x129   :  { %v133_v35 = vpop.f32.mrf.mxu1 }
 0x12a   :  { %v134_v44 = vadd.f32 %v133_v35, %v86_v28 }
 0x12c   :  { %v143_v48 = vmax.f32 %v134_v44, 0.0 }
 0x130   :  { %v188_v61 = vpop.f32.mrf.mxu2 }
 0x131   :  { %v136_v39 = vpop.f32.mrf.mxu1 }
 0x132   :  { %v137_v42 = vadd.f32 %v136_v39, %v90_v30 }
 0x134   :  { %v144_v47 = vmax.f32 %v137_v42, 0.0 }
 0x139   :  { %v139_v41 = vpop.f32.mrf.mxu1 }
 0x13a   :  { %v140_v43 = vadd.f32 %v139_v41, %v94_v27 }
 0x13c   :  { %v145_v45 = vmax.f32 %v140_v43, 0.0 }
 0x13e   :  { %219 = vmatpush.msra.mxu3 %v145_v45 }
 0x140   :  { %220 = vmatpush.msra.mxu3 %v144_v47 }
 0x142   :  { %221 = vmatpush.msra.mxu3 %v143_v48 }
 0x144   :  { %222 = vmatpush.msra.mxu3 %v142_v49 }
 0x145   :  { %308 = vmatmul.msk.f32.vlgmr.msra.gmra.mxu3 %vm104_vm1, %v192_v33 }
 0x14d   :  { %309 = vmatmul.msk.f32.gmra.mxu3 %vm104_vm1, %v194_v37 }
 0x155   :  { %310 = vmatmul.msk.f32.gmra.mxu3 %vm104_vm1, %v196_v50 }
 0x15d   :  { %311 = vmatmul.msk.f32.gmra.mxu3 %vm104_vm1, %v198_v51 }
 0x1c8   :  { %v224_v53 = vpop.f32.mrf.mxu3 }
 0x1c9   :  { %v225_v4 = vadd.f32 %v224_v53, %v179_v52 }
 0x1cb   :  { %v252_v10 = vadd.f32 %v238_v7, %v225_v4 }
 0x1cd   :  { %v256_v13 = vmax.f32 %v252_v10, 0.0 }
 0x1d0   :  { %v227_v57 = vpop.f32.mrf.mxu3 }
 0x1d1   :  { %v228_v1 = vadd.f32 %v227_v57, %v182_v54 }
 0x1d3   :  { %v253_v8 = vadd.f32 %v242_v3, %v228_v1 }
 0x1d5   :  { %v257_v12 = vmax.f32 %v253_v8, 0.0 }
 0x1d8   :  { %v230_v59 = vpop.f32.mrf.mxu3 }
 0x1d9   :  { %v231_v62 = vadd.f32 %v230_v59, %v185_v58 }
 0x1db   :  { %v254_v6 = vadd.f32 %v246_v60, %v231_v62 }
 0x1dd   :  { %v258_v11 = vmax.f32 %v254_v6, 0.0 }
 0x1e0   :  { %v233_v63 = vpop.f32.mrf.mxu3 }
 0x1e1   :  { %v234_v2 = vadd.f32 %v233_v63, %v188_v61 }
 0x1e3   :  { %v255_v5 = vadd.f32 %v250_v0, %v234_v2 }
 0x1e5   :  { %v259_v9 = vmax.f32 %v255_v5, 0.0 }
 0x1e7   :  { %277 = vmatpush.msrb.mxu0 %v259_v9 }
 0x1e9   :  { %278 = vmatpush.msrb.mxu0 %v258_v11 }
 0x1eb   :  { %279 = vmatpush.msrb.mxu0 %v257_v12 }
 0x1ed   :  { %280 = vmatpush.msrb.mxu0 %v256_v13 }
 0x1ee   :  { %312 = vmatmul.msk.f32.vlgmr.msrb.gmra.mxu0 %vm104_vm1, %v262_v14 }
 0x26b   :  { %v282_v16 = vpop.f32.mrf.mxu0 }
 0x26c   :  { %v290_v17 = vadd.f32 %v288_v15, %v282_v16 }
 0x26e   :  { %291 = vst [vmem:[%s430_s2] sm:$0x1] %v290_v17 }

</bundles_post_ra>
